<compile_context>
chip_gen: v7x
topology: tpu7x:2x2x1
jax: 0.10.0
libtpu: 0.0.40
codegen_flags: <defaults>
</compile_context>

<pallas_src>
import functools

import jax
import jax.numpy as jnp
from jax import lax
from jax.experimental import pallas as pl
from jax.experimental.pallas import tpu as pltpu


def _affine_grid_kernel(theta_ref, out_ref, *, bt, out_h, out_w, lanes):
    # theta_ref : SMEM (B*6,) float32   (scalar-prefetch, loaded once)
    # out_ref   : VMEM (bt, rows, lanes) float32, interleaved Xp/Yp along lanes
    rows = out_ref.shape[1]
    step = pl.program_id(0)

    lane = lax.broadcasted_iota(jnp.int32, (rows, lanes), 1)
    c_is_x = (lane & 1) == 0          # even flat position -> Xp, odd -> Yp

    sx = 2.0 / max(out_w - 1, 1)      # linspace(-1, 1, W) step
    sy = 2.0 / max(out_h - 1, 1)      # linspace(-1, 1, H) step

    if lanes == 2 * out_w:
        # Natural layout: block row == image row, lane pair == image column.
        hi = lax.broadcasted_iota(jnp.int32, (rows, lanes), 0)
        hf = hi.astype(jnp.float32)
        wf = (lane >> 1).astype(jnp.float32)
    else:
        # Lane-dense flattened layout: flat = h*(2W) + 2*w + c.
        row = lax.broadcasted_iota(jnp.int32, (rows, lanes), 0)
        pos = (row * lanes + lane) >> 1          # = h*W + w  (exact int32)
        posf = pos.astype(jnp.float32)           # exact: wrapper guards H*W <= 2^21
        hf = jnp.floor((posf + 0.5) * (1.0 / out_w))
        wf = posf - hf * out_w

    x = wf * sx - 1.0                 # grid_X value at this output element
    y = hf * sy - 1.0                 # grid_Y value at this output element

    for bi in range(bt):              # bt is small and static
        base = (step * bt + bi) * 6
        t0 = theta_ref[base + 0]
        t1 = theta_ref[base + 1]
        t2 = theta_ref[base + 2]
        t3 = theta_ref[base + 3]
        t4 = theta_ref[base + 4]
        t5 = theta_ref[base + 5]
        xp = x * t0 + y * t1 + t2     # grid_Xp
        yp = x * t3 + y * t4 + t5     # grid_Yp
        out_ref[bi] = jnp.where(c_is_x, xp, yp)


def affine_grid_gen_v2(theta, out_h=240, out_w=240):
    """Pallas implementation of AffineGridGenV2.forward.

    theta: (B, 6) or anything reshapeable to (B, 6) (e.g. (B, 2, 3)).
    Returns: (B, out_h, out_w, 2) float32, == torch.cat((Xp, Yp), dim=3).
    """
    b = theta.shape[0]
    theta_flat = jnp.reshape(theta, (b * 6,)).astype(jnp.float32)

    total = 2 * out_h * out_w
    # Choose the output layout: interleaved Xp/Yp flattened row-major, with a
    # lane-dense (multiple of 128) last dim whenever the flat index can be
    # decoded exactly in f32; otherwise fall back to the natural (H, 2W).
    lanes = None
    if total % 128 == 0 and out_h * out_w <= (1 << 21):
        for cand in (2048, 1024, 512, 256, 128):
            if total % cand == 0:
                lanes = cand
                break
    if lanes is None:
        lanes = 2 * out_w
    rows = total // lanes

    # Batch-block grid steps (~1 MiB output blocks) to amortize per-step
    # overhead for small H*W; keep >= 2 grid steps so the parallel batch axis
    # can shard across v7x's two TensorCores.
    per_elem_bytes = total * 4
    bt_cap = max(1, (1 << 20) // per_elem_bytes)
    if b >= 2:
        bt_cap = min(bt_cap, b // 2)
    bt = 1
    for cand in range(min(bt_cap, b), 0, -1):
        if b % cand == 0:
            bt = cand
            break

    kernel = functools.partial(
        _affine_grid_kernel, bt=bt, out_h=out_h, out_w=out_w, lanes=lanes)

    out = pl.pallas_call(
        kernel,
        out_shape=jax.ShapeDtypeStruct((b, rows, lanes), jnp.float32),
        grid_spec=pltpu.PrefetchScalarGridSpec(
            num_scalar_prefetch=1,                 # theta -> SMEM, loaded once
            grid=(b // bt,),
            in_specs=[],
            out_specs=pl.BlockSpec((bt, rows, lanes),
                                   lambda i, theta_smem: (i, 0, 0)),
        ),
        compiler_params=pltpu.CompilerParams(
            dimension_semantics=("parallel",)),
        cost_estimate=pl.CostEstimate(
            flops=8 * b * out_h * out_w,
            transcendentals=0,
            bytes_accessed=b * total * 4 + b * 6 * 4),
    )(theta_flat)

    # (B, rows, lanes) row-major is bit-identical to (B, H, W, 2) row-major:
    # free metadata reshape, no transpose / HBM round trip.
    return jnp.reshape(out, (b, out_h, out_w, 2))


def _reference(theta, out_h, out_w):
    b = theta.shape[0]
    theta = jnp.reshape(theta, (b, 6)).astype(jnp.float32)
    gx, gy = jnp.meshgrid(
        jnp.linspace(-1.0, 1.0, out_w, dtype=jnp.float32),
        jnp.linspace(-1.0, 1.0, out_h, dtype=jnp.float32),
    )
    t = theta[:, :, None, None]            # (B, 6, 1, 1)
    xp = gx[None] * t[:, 0] + gy[None] * t[:, 1] + t[:, 2]
    yp = gx[None] * t[:, 3] + gy[None] * t[:, 4] + t[:, 5]
    return jnp.stack([xp, yp], axis=-1)    # (B, H, W, 2)


if __name__ == "__main__":
    key = jax.random.PRNGKey(0)

    # Primary check: module-style theta (B, 2, 3); exercises the lane-dense
    # flattened layout (2*16*16 = 512 is a multiple of 128).
    B, H, W = 2, 16, 16
    theta = jax.random.normal(key, (B, 2, 3), dtype=jnp.float32)
    out = jax.block_until_ready(affine_grid_gen_v2(theta, out_h=H, out_w=W))
    ref = _reference(theta, H, W)
    assert out.shape == (B, H, W, 2), out.shape
    assert jnp.allclose(out, ref, atol=1e-5, rtol=1e-5), "mismatch (lane-dense path)"

    # Secondary check: exercises the natural (H, 2W) fallback layout
    # (2*12*10 = 240 not a multiple of 128) and batch-blocked steps (bt=2).
    B2, H2, W2 = 4, 12, 10
    theta2 = jax.random.normal(jax.random.PRNGKey(0), (B2, 6), dtype=jnp.float32)
    out2 = jax.block_until_ready(affine_grid_gen_v2(theta2, out_h=H2, out_w=W2))
    ref2 = _reference(theta2, H2, W2)
    assert out2.shape == (B2, H2, W2, 2), out2.shape
    assert jnp.allclose(out2, ref2, atol=1e-5, rtol=1e-5), "mismatch (fallback path)"

    print("KERNEL_OK")
</pallas_src>

<mosaic_0001>
module attributes {stable_mosaic.version = 11 : i64} {
  func.func @_affine_grid_kernel(%arg0: i32, %arg1: memref<12xf32, #tpu.memory_space<smem>>, %arg2: memref<1x1x512xf32, #tpu.memory_space<vmem>>) attributes {dimension_semantics = [#tpu.dimension_semantics<parallel>], iteration_bounds = array<i64: 2>, scalar_prefetch = 1 : i64, scratch_operands = 0 : i64, tpu.core_type = #tpu.core_type<tc>, window_params = [{transform_indices = @transform_0, window_bounds = array<i64: 1, 1, 512>}]} {
    %0 = tpu.iota {dimensions = array<i32: 1>} : vector<1x512xi32>
    %c1_i32 = arith.constant 1 : i32
    %1 = vector.broadcast %c1_i32 : i32 to vector<1x512xi32>
    %2 = arith.andi %0, %1 : vector<1x512xi32>
    %c0_i32 = arith.constant 0 : i32
    %3 = vector.broadcast %c0_i32 : i32 to vector<1x512xi32>
    %4 = arith.cmpi eq, %2, %3 : vector<1x512xi32>
    %5 = tpu.iota {dimensions = array<i32: 0>} : vector<1x512xi32>
    %c512_i32 = arith.constant 512 : i32
    %6 = vector.broadcast %c512_i32 : i32 to vector<1x512xi32>
    %7 = arith.muli %5, %6 : vector<1x512xi32>
    %8 = arith.addi %7, %0 : vector<1x512xi32>
    %c1_i32_0 = arith.constant 1 : i32
    %9 = vector.broadcast %c1_i32_0 : i32 to vector<1x512xi32>
    %10 = arith.shrsi %8, %9 : vector<1x512xi32>
    %11 = arith.sitofp %10 : vector<1x512xi32> to vector<1x512xf32>
    %cst = arith.constant 5.000000e-01 : f32
    %12 = vector.broadcast %cst : f32 to vector<1x512xf32>
    %13 = arith.addf %11, %12 : vector<1x512xf32>
    %cst_1 = arith.constant 6.250000e-02 : f32
    %14 = vector.broadcast %cst_1 : f32 to vector<1x512xf32>
    %15 = arith.mulf %13, %14 : vector<1x512xf32>
    %16 = math.floor %15 : vector<1x512xf32>
    %cst_2 = arith.constant 1.600000e+01 : f32
    %17 = vector.broadcast %cst_2 : f32 to vector<1x512xf32>
    %18 = arith.mulf %16, %17 : vector<1x512xf32>
    %19 = arith.subf %11, %18 : vector<1x512xf32>
    %cst_3 = arith.constant 0.13333334 : f32
    %20 = vector.broadcast %cst_3 : f32 to vector<1x512xf32>
    %21 = arith.mulf %19, %20 : vector<1x512xf32>
    %cst_4 = arith.constant 1.000000e+00 : f32
    %22 = vector.broadcast %cst_4 : f32 to vector<1x512xf32>
    %23 = arith.subf %21, %22 : vector<1x512xf32>
    %cst_5 = arith.constant 0.13333334 : f32
    %24 = vector.broadcast %cst_5 : f32 to vector<1x512xf32>
    %25 = arith.mulf %16, %24 : vector<1x512xf32>
    %cst_6 = arith.constant 1.000000e+00 : f32
    %26 = vector.broadcast %cst_6 : f32 to vector<1x512xf32>
    %27 = arith.subf %25, %26 : vector<1x512xf32>
    %c1_i32_7 = arith.constant 1 : i32
    %28 = arith.muli %arg0, %c1_i32_7 : i32
    %c0_i32_8 = arith.constant 0 : i32
    %29 = arith.addi %28, %c0_i32_8 : i32
    %c6_i32 = arith.constant 6 : i32
    %30 = arith.muli %29, %c6_i32 : i32
    %c0_i32_9 = arith.constant 0 : i32
    %31 = arith.addi %30, %c0_i32_9 : i32
    %32 = arith.index_cast %31 : i32 to index
    %33 = memref.load %arg1[%32] : memref<12xf32, #tpu.memory_space<smem>>
    %c1_i32_10 = arith.constant 1 : i32
    %34 = arith.addi %30, %c1_i32_10 : i32
    %35 = arith.index_cast %34 : i32 to index
    %36 = memref.load %arg1[%35] : memref<12xf32, #tpu.memory_space<smem>>
    %c2_i32 = arith.constant 2 : i32
    %37 = arith.addi %30, %c2_i32 : i32
    %38 = arith.index_cast %37 : i32 to index
    %39 = memref.load %arg1[%38] : memref<12xf32, #tpu.memory_space<smem>>
    %c3_i32 = arith.constant 3 : i32
    %40 = arith.addi %30, %c3_i32 : i32
    %41 = arith.index_cast %40 : i32 to index
    %42 = memref.load %arg1[%41] : memref<12xf32, #tpu.memory_space<smem>>
    %c4_i32 = arith.constant 4 : i32
    %43 = arith.addi %30, %c4_i32 : i32
    %44 = arith.index_cast %43 : i32 to index
    %45 = memref.load %arg1[%44] : memref<12xf32, #tpu.memory_space<smem>>
    %c5_i32 = arith.constant 5 : i32
    %46 = arith.addi %30, %c5_i32 : i32
    %47 = arith.index_cast %46 : i32 to index
    %48 = memref.load %arg1[%47] : memref<12xf32, #tpu.memory_space<smem>>
    %49 = vector.broadcast %33 : f32 to vector<1x512xf32>
    %50 = arith.mulf %23, %49 : vector<1x512xf32>
    %51 = vector.broadcast %36 : f32 to vector<1x512xf32>
    %52 = arith.mulf %27, %51 : vector<1x512xf32>
    %53 = arith.addf %50, %52 : vector<1x512xf32>
    %54 = vector.broadcast %39 : f32 to vector<1x512xf32>
    %55 = arith.addf %53, %54 : vector<1x512xf32>
    %56 = vector.broadcast %42 : f32 to vector<1x512xf32>
    %57 = arith.mulf %23, %56 : vector<1x512xf32>
    %58 = vector.broadcast %45 : f32 to vector<1x512xf32>
    %59 = arith.mulf %27, %58 : vector<1x512xf32>
    %60 = arith.addf %57, %59 : vector<1x512xf32>
    %61 = vector.broadcast %48 : f32 to vector<1x512xf32>
    %62 = arith.addf %60, %61 : vector<1x512xf32>
    %63 = arith.select %4, %55, %62 : vector<1x512xi1>, vector<1x512xf32>
    %c0 = arith.constant 0 : index
    %c0_11 = arith.constant 0 : index
    %c0_12 = arith.constant 0 : index
    %64 = vector.load %arg2[%c0, %c0_11, %c0_12] : memref<1x1x512xf32, #tpu.memory_space<vmem>>, vector<1x1x512xf32>
    %65 = vector.shape_cast %64 : vector<1x1x512xf32> to vector<1x512xf32>
    %66 = vector.shape_cast %63 : vector<1x512xf32> to vector<1x1x512xf32>
    tpu.vector_store %arg2[%c0, %c0_11, %c0_12], %66 {strides = array<i32>} : memref<1x1x512xf32, #tpu.memory_space<vmem>>, vector<1x1x512xf32>,
    return
  }
  func.func @transform_0(%arg0: i32, %arg1: memref<12xf32, #tpu.memory_space<smem>>) -> (i32, i32, i32) {
    %c0_i32 = arith.constant 0 : i32
    %c0_i32_0 = arith.constant 0 : i32
    %c0_i32_1 = arith.constant 0 : i32
    return %arg0, %c0_i32, %c0_i32_0 : i32, i32, i32
  }
}

</mosaic_0001>

<bundles_post_ra>
// kernel: tpu_custom_call.1
= control target key start
LH: loop header
LB: loop body
LE: loop exit
PB: predicated region body
PF: predicated region fallthrough
CT: control target
= control target key end

     0   :  { %s568_s0 = inlined_call_operand.hbm [shape: f32[12], index: 0, kind: input, shape index: {}]   ;;  %s569_s1 = inlined_call_operand.hbm [shape: f32[2,1,512], index: 1, kind: output, shape index: {}]  }
   0x1   :  { %s312_s8 = scalar_lea.hbm %s568_s0, 16 }
   0x2   :  { %p313_p0 = scmp.ne.s32.totalorder %s568_s0, %s312_s8  ;;  %p316_p1 = scmp.lt.u32.totalorder %s312_s8, %s568_s0 }
   0x4   :  { %p318_p2 = pnand %p316_p1, %p313_p0 }
   0x6   :  { %321 = shalt.err (!%p318_p2)  }
   0x7   :  { %s380_s13 = smov [#allocation3]  }
   0x8   :  { %7 = dma.hbm_to_smem %s568_s0, 16, %s380_s13, [#allocation2] }
   0x9   :  { %362 = dma.done.wait [#allocation2], 16 }
   0xa   :  { %363 = vsyncadd [#allocation2], 4294967280 }
   0xb   :  { %9 = sfence }
   0xc   :  { %10 = vsyncpa [#allocation5], 0 }
   0xd   :  { %12 = vsyncpa [#allocation5 + $0x1], 0  ;;  %s405_s16 = smov 0   ;;  %s407_s17 = smov 0  }
   0xe   :  { %s409_s18 = smov 0  }
   0xf LB: > { %s261_s0 = sadd.s32 4294967295, %s378_s18   ;;  %s422_s19 = sadd.s32 1, %s378_s18   ;;  %s378_s18 = sphi %s409_s18, %s580_s18   ;;  %s374_s17 = sphi %s407_s17, %s579_s17   ;;  %s370_s16 = sphi %s405_s16, %s578_s16  }
  0x10   : > { %s21_s20 = ssub.s32 %s378_s18, %s422_s19  ;;  %s24_s21 = sadd.s32 1, %s374_s17 }
  0x11   : > { %p22_p3 = scmp.eq.s32.totalorder %s21_s20, 0  ;;  %p262_p4 = scmp.ne.s32.totalorder %s21_s20, 0 }
  0x12   : > { %p28_p5 = scmp.eq.s32.totalorder %s378_s18, 1  ;;  %p33_p6 = scmp.ne.s32.totalorder %s374_s17, %s370_s16 }
  0x13   : > { %s431_s22 = scalar_select %p22_p3, %s374_s17, %s24_s21  }
  0x14   : > { %p433_p7 = por %p262_p4, %p28_p5  ;;  %p34_p8 = scmp.eq.s32.totalorder %s261_s0, 1 }
  0x15   : > { %p263_p10 = scmp.ge.s32.totalorder %s378_s18, 2 }
  0x16   : > { %p437_p9 = por %p34_p8, %p33_p6  ;;  %v51_v0 = vlaneseq (!%p263_p10)  ;;  %s449_s25 = smul.u32 (!%p263_p10), 6, %s378_s18  ;;  %v381_v15 = vmov (!%p263_p10), 1966171168  }
  0x17   : > { %43 = sbr.rel (%p263_p10) target bundleno = 80 (0x50), region = 12  ;;  %v478_v16 = vunpack.c.l.s4 (!%p263_p10), %v381_v15  ;;  %s48_s8 = sand.u32 (!%p263_p10), 1, %s374_s17  }
  0x18   : > { %v443_v1 = vand.u32 (!%p263_p10), 127, %v51_v0  ;;  %v446_v2 = vshrl.u32 (!%p263_p10), %v51_v0, 7  ;;  %s117_s26 = sadd.s32 (!%p263_p10), 1, %s449_s25  ;;  %s119_s27 = sadd.s32 (!%p263_p10), 2, %s449_s25  ;;  %vm200_vm4 = vcmp.lt.s32.totalorder (!%p263_p10), %v51_v0, 512 }
  0x19   : > { %s121_s28 = sadd.s32 (!%p263_p10), 3, %s449_s25  ;;  %s469_s29 = sld [smem:[#allocation3 + %s449_s25]] (!%p263_p10)  ;;  %v177_v25 = vunpack.c.0.s8 (!%p263_p10), %v478_v16 }
  0x1a   : > { %v452_v3 = vadd.s32 (!%p263_p10), 128, %v443_v1  ;;  %v455_v4 = vadd.s32 (!%p263_p10), 256, %v443_v1  ;;  %v458_v5 = vadd.s32 (!%p263_p10), 384, %v443_v1  ;;  %v66_v6 = vmul.u32 (!%p263_p10), 512, %v446_v2  ;;  %s471_s30 = sld [smem:[#allocation3 + %s117_s26]] (!%p263_p10)  ;;  %s123_s2 = sadd.s32 (!%p263_p10), 4, %s449_s25 }
  0x1b   : > { %s474_s3 = sld [smem:[#allocation3 + %s119_s27]] (!%p263_p10)  ;;  %s125_s6 = sadd.s32 (!%p263_p10), 5, %s449_s25  ;;  %v56_v30 = vand.u32 (!%p263_p10), 1, %v443_v1 }
  0x1c   : > { %v67_v7 = vadd.s32 (!%p263_p10), %v66_v6, %v443_v1  ;;  %v68_v8 = vadd.s32 (!%p263_p10), %v66_v6, %v452_v3  ;;  %v69_v9 = vadd.s32 (!%p263_p10), %v66_v6, %v455_v4  ;;  %v70_v10 = vadd.s32 (!%p263_p10), %v66_v6, %v458_v5  ;;  %s476_s4 = sld [smem:[#allocation3 + %s121_s28]] (!%p263_p10)  ;;  %s264_s9 = sshll.u32 (!%p263_p10), %s48_s8, 2 }
  0x1d   : > { %s480_s5 = sld [smem:[#allocation3 + %s123_s2]] (!%p263_p10)  ;;  %v57_v31 = vand.u32 (!%p263_p10), 1, %v452_v3  ;;  %v58_v32 = vand.u32 (!%p263_p10), 1, %v455_v4  ;;  %v59_v33 = vand.u32 (!%p263_p10), 1, %v458_v5  ;;  %vm495_vm0 = vcmp.eq.s32.totalorder (!%p263_p10), %v56_v30, 0  ;;  %s278_s10 = sshll.u32 (!%p263_p10), %s378_s18, 6 }
  0x1e   : > { %v71_v11 = vshra.s32 %v67_v7, 1  ;;  %v72_v12 = vshra.s32 %v68_v8, 1  ;;  %v73_v13 = vshra.s32 %v69_v9, 1  ;;  %v74_v14 = vshra.s32 %v70_v10, 1  ;;  %s484_s7 = sld [smem:[#allocation3 + %s125_s6]]  ;;  %s50_s11 = scalar_lea.vmem [#allocation4], %s264_s9 }
  0x1f   : > { %v127_v38 = vstv %s469_s29  ;;  %vm499_vm1 = vcmp.eq.s32.totalorder %v57_v31, 0  ;;  %vm504_vm2 = vcmp.eq.s32.totalorder %v58_v32, 0  ;;  %vm63_vm3 = vcmp.eq.s32.totalorder %v59_v33, 0  ;;  %s218_s12 = sshll.u32 %s50_s11, 4  ;;  %s527_s15 = scalar_lea.hbm %s569_s1, %s278_s10  ;;  %s529_s12 = int_to_ptr.vmem [resolvable:$true] %s218_s12 }
  0x20   : > { %v75_v17 = vcvt.s32.f32 %v71_v11  ;;  %v76_v18 = vcvt.s32.f32 %v72_v12  ;;  %v77_v19 = vcvt.s32.f32 %v73_v13  ;;  %v78_v20 = vcvt.s32.f32 %v74_v14  ;;  %s204_s0 = scalar_lea.sflag [#allocation5], %s48_s8  ;;  %s322_s20 = scalar_lea.vmem %s529_s12, 64 }
  0x21   : > { %v132_v39 = vstv %s471_s30  ;;  %v141_v40 = vstv %s474_s3  ;;  %p323_p11 = scmp.ne.s32.totalorder %s529_s12, %s322_s20  ;;  %s382_s21 = smov [#allocation4]  }
  0x22   : > { %v79_v21 = vadd.f32 0.5, %v75_v17  ;;  %v80_v22 = vadd.f32 0.5, %v76_v18  ;;  %v81_v23 = vadd.f32 0.5, %v77_v19  ;;  %v82_v24 = vadd.f32 0.5, %v78_v20  ;;  %s326_s25 = sshll.u32 %s382_s21, 4  ;;  %s327_s25 = int_to_ptr.vmem [resolvable:$false] %s326_s25 }
  0x23   : > { %v146_v41 = vstv %s476_s4  ;;  %v151_v49 = vstv %s480_s5  ;;  %p324_p12 = pnand %p323_p11, %p433_p7  ;;  %s328_s26 = scalar_lea.vmem %s327_s25, 128 }
  0x24   : > { %v83_v26 = vmul.f32 0.0625, %v79_v21  ;;  %v84_v27 = vmul.f32 0.0625, %v80_v22  ;;  %v85_v28 = vmul.f32 0.0625, %v81_v23  ;;  %v86_v29 = vmul.f32 0.0625, %v82_v24  ;;  %p329_p0 = scmp.lt.s32.totalorder %s529_s12, %s327_s25  ;;  %p330_p1 = scmp.lt.s32.totalorder %s328_s26, %s322_s20 }
  0x25   : > { %v160_v63 = vstv %s484_s7  ;;  %p325_p13 = pneg %p324_p12 }
  0x26   : > { %v87_v34 = vfloor.f32 %v83_v26  ;;  %v88_v35 = vfloor.f32 %v84_v27  ;;  %v89_v36 = vfloor.f32 %v85_v28  ;;  %v90_v37 = vfloor.f32 %v86_v29  ;;  %p331_p2 = por %p330_p1, %p329_p0 }
  0x28   : > { %v91_v42 = vmul.f32 16.0, %v87_v34  ;;  %v92_v43 = vmul.f32 16.0, %v88_v35  ;;  %v93_v44 = vmul.f32 16.0, %v89_v36  ;;  %v94_v45 = vmul.f32 16.0, %v90_v37  ;;  %p332_p3 = pnand %p331_p2, %p325_p13 }
  0x29   : > { %v107_v46 = vmul.f32 0.13333334, %v87_v34  ;;  %v108_v47 = vmul.f32 0.13333334, %v88_v35  ;;  %v109_v48 = vmul.f32 0.13333334, %v89_v36 }
  0x2a   : > { %v95_v50 = vsub.f32 %v75_v17, %v91_v42  ;;  %v96_v51 = vsub.f32 %v76_v18, %v92_v43  ;;  %v97_v52 = vsub.f32 %v77_v19, %v93_v44  ;;  %v98_v53 = vsub.f32 %v78_v20, %v94_v45 }
  0x2b   : > { %v110_v54 = vmul.f32 0.13333334, %v90_v37  ;;  %v269_v55 = vadd.f32 -1.0, %v107_v46  ;;  %v270_v56 = vadd.f32 -1.0, %v108_v47  ;;  %v271_v57 = vadd.f32 -1.0, %v109_v48 }
  0x2c   : > { %v99_v60 = vmul.f32 0.13333334, %v95_v50  ;;  %v100_v61 = vmul.f32 0.13333334, %v96_v51  ;;  %v101_v62 = vmul.f32 0.13333334, %v97_v52  ;;  %v180_v45 = vsub.s32 %v177_v25, %v446_v2 }
  0x2d   : > { %v102_v3 = vmul.f32 0.13333334, %v98_v53  ;;  %v272_v4 = vadd.f32 -1.0, %v110_v54  ;;  %v133_v6 = vmul.f32 %v269_v55, %v132_v39  ;;  %v134_v7 = vmul.f32 %v270_v56, %v132_v39 }
  0x2e   : > { %v265_v8 = vadd.f32 -1.0, %v99_v60  ;;  %v266_v9 = vadd.f32 -1.0, %v100_v61  ;;  %v267_v10 = vadd.f32 -1.0, %v101_v62  ;;  %v135_v11 = vmul.f32 %v271_v57, %v132_v39 }
  0x2f   : > { %v268_v12 = vadd.f32 -1.0, %v102_v3  ;;  %v136_v13 = vmul.f32 %v272_v4, %v132_v39  ;;  %v152_v14 = vmul.f32 %v269_v55, %v151_v49  ;;  %v153_v15 = vmul.f32 %v270_v56, %v151_v49 }
  0x30   : > { %v128_v17 = vmul.f32 %v265_v8, %v127_v38  ;;  %v129_v18 = vmul.f32 %v266_v9, %v127_v38  ;;  %v130_v19 = vmul.f32 %v267_v10, %v127_v38  ;;  %v147_v20 = vmul.f32 %v265_v8, %v146_v41 }
  0x31   : > { %v131_v21 = vmul.f32 %v268_v12, %v127_v38  ;;  %v148_v22 = vmul.f32 %v266_v9, %v146_v41  ;;  %v149_v23 = vmul.f32 %v267_v10, %v146_v41  ;;  %v150_v24 = vmul.f32 %v268_v12, %v146_v41 }
  0x32   : > { %v137_v26 = vadd.f32 %v133_v6, %v128_v17  ;;  %v138_v27 = vadd.f32 %v134_v7, %v129_v18  ;;  %v139_v28 = vadd.f32 %v135_v11, %v130_v19  ;;  %v154_v29 = vmul.f32 %v271_v57, %v151_v49 }
  0x33   : > { %v140_v30 = vadd.f32 %v136_v13, %v131_v21  ;;  %v155_v31 = vmul.f32 %v272_v4, %v151_v49  ;;  %v156_v32 = vadd.f32 %v152_v14, %v147_v20  ;;  %v157_v34 = vadd.f32 %v153_v15, %v148_v22 }
  0x34   : > { %v142_v35 = vadd.f32 %v141_v40, %v137_v26  ;;  %v143_v36 = vadd.f32 %v141_v40, %v138_v27  ;;  %v144_v37 = vadd.f32 %v141_v40, %v139_v28  ;;  %v158_v39 = vadd.f32 %v154_v29, %v149_v23 }
  0x35   : > { %v145_v42 = vadd.f32 %v141_v40, %v140_v30  ;;  %v159_v43 = vadd.f32 %v155_v31, %v150_v24  ;;  %v161_v38 = vadd.f32 %v160_v63, %v156_v32  ;;  %v162_v44 = vadd.f32 %v160_v63, %v157_v34 }
  0x36   : > { %v163_v41 = vadd.f32 %v160_v63, %v158_v39 }
  0x37   : > { %v164_v46 = vadd.f32 %v160_v63, %v159_v43  ;;  %v165_v47 = vsel %vm495_vm0, %v142_v35, %v161_v38  ;;  %v166_v40 = vsel %vm499_vm1, %v143_v36, %v162_v44 }
  0x38   : > { %v167_v48 = vsel %vm504_vm2, %v144_v37, %v163_v41  ;;  %v173_v5 = vcombine.low %v165_v47, %v166_v40 }
  0x39   : > { %v168_v33 = vsel %vm63_vm3, %v145_v42, %v164_v46 }
  0x3a   : > { %v174_v49 = vcombine.low %v167_v48, %v168_v33  ;;  %v181_v50 = vrot.slane %v173_v5, %v180_v45 }
  0x3c   : > { %v188_v16 = vrot.slane %v174_v49, %v180_v45 }
  0x3e   : > { %v189_v2 = vcombine.low %v181_v50, %v188_v16 }
  0x40   : > { %v196_v25 = vrot.slane %v189_v2, %v180_v45 }
  0x42   : > { %202 = vst.msk [vmem:[%s50_s11] sm:$0xf] %vm200_vm4, %v196_v25 }
  0x43   : > { %335 = shalt.err (!%p332_p3)
}
  0x44   : > { %s336_s27 = scalar_lea.hbm %s527_s15, 64  ;;  %s340_s30 = scalar_lea.hbm %s569_s1, 128 }
  0x45   : > { %p337_p4 = scmp.ne.s32.totalorder %s527_s15, %s336_s27  ;;  %p341_p8 = scmp.lt.u32.totalorder %s527_s15, %s569_s1 }
  0x46   : > { %p342_p10 = scmp.lt.u32.totalorder %s340_s30, %s336_s27  ;;  %p344_p12 = scmp.lt.u32.totalorder %s336_s27, %s527_s15 }
  0x47   : > { %p338_p5 = pnand %p337_p4, %p433_p7 }
  0x48   : > { %p343_p11 = por %p342_p10, %p341_p8 }
  0x49   : > { %p339_p6 = pneg %p338_p5 }
  0x4a   : > { %p345_p13 = por %p344_p12, %p343_p11 }
  0x4c   : > { %p346_p0 = pnand %p345_p13, %p339_p6 }
  0x4e   : > { %349 = shalt.err (!%p346_p0)
}
  0x4f   : > { %279 = dma.vmem_to_hbm [thread:$0]  (%p433_p7), %s529_s12, 64, %s527_s15, %s204_s0  }
  0x50 PF: > { %p285_p1 = scmp.ge.s32.totalorder %s378_s18, 1  ;;  %s230_s4 = sand.u32 1, %s370_s16  }
  0x51   : > { %s231_s5 = scalar_lea.sflag [#allocation5], %s230_s4 }
  0x52   : > { %p282_p2 = pnand %p285_p1, %p437_p9 }
  0x54   : > { %365 = dma.done.wait (!%p282_p2), %s231_s5, 64  }
  0x55   : > { %367 = vsyncadd (!%p282_p2), %s231_s5, 4294967232  ;;  %p15_p3 = scmp.ge.s32.totalorder %s422_s19, 3   ;;  %s578_s16 = smov %s374_s17 }
  0x56   : > { %s579_s17 = smov %s431_s22  ;;  %s580_s18 = smov %s422_s19 }
  0x57   :  { %17 = sbr.rel (!%p15_p3) target bundleno = 15 (0xf), region = 44 }
  0x5e   :  { %236 = vsyncpa [#allocation5], 1 }
  0x5f   :  { %238 = vsyncpa [#allocation5 + $0x1], 1 }

</bundles_post_ra>
